<compile_context>
chip_gen: v5e
topology: v5e:2x2
jax: 0.10.0
libtpu: 0.0.40
codegen_flags: <defaults>
</compile_context>

<pallas_src>
import jax
import jax.numpy as jnp
from jax import lax
from jax.experimental import pallas as pl
from jax.experimental.pallas import tpu as pltpu


def _gelu_exact(x):
    # torch.nn.GELU() default (approximate='none'): 0.5*x*(1+erf(x/sqrt(2)))
    return 0.5 * x * (1.0 + lax.erf(x * jnp.float32(0.7071067811865476)))


def _round_up(n, m):
    return ((n + m - 1) // m) * m


def cls_boost_head_kernel(x_ref, wc_ref, bc_ref, w1_ref, b1_ref,
                          w2_ref, b2_ref, wl_ref, bl_ref, o_ref):
    # x_ref: (TB, H, W, C) block, channels on the lane axis.
    tb, H, W, C = x_ref.shape
    inv_w = jnp.float32(1.0 / W)
    inv_h = jnp.float32(1.0 / H)
    inv_l = jnp.float32(1.0 / (H * W))

    x = x_ref[...]                                        # (TB, H, W, C)

    # ---- Adaptive pools (batched axis reductions, VPU/XLU only) -------------
    xh = jnp.sum(x, axis=2) * inv_w                       # (TB, H, C) mean over W
    xw = jnp.sum(x, axis=1) * inv_h                       # (TB, W, C) mean over H

    # ---- Shared 1x1 conv as ONE matmul over a (TB*(H+W), C) slab ------------
    # NOTE(perf): for production shapes cast `pooled`/`wc` to bf16 here
    # (preferred_element_type stays f32) -- kept f32 for the 1e-4 check.
    pooled = jnp.concatenate(
        [xh.reshape(tb * H, C), xw.reshape(tb * W, C)], axis=0)      # (TB*(H+W), C)
    attn = jax.nn.sigmoid(
        jnp.dot(pooled, wc_ref[...], preferred_element_type=jnp.float32)
        + bc_ref[...])                                    # (TB*(H+W), C)
    ah = attn[:tb * H].reshape(tb, H, C)                  # (TB, H, C)
    aw = attn[tb * H:].reshape(tb, W, C)                  # (TB, W, C)

    # ---- Weighted global-average-pool (batched) ------------------------------
    #   gap[b,c] = 1/L * sum_h ah[b,h,c] * sum_w x[b,h,w,c] * aw[b,w,c]
    t = jnp.sum(x * aw[:, None, :, :], axis=2)            # (TB, H, C)
    gap = jnp.sum(ah * t, axis=1) * inv_l                 # (TB, C)

    # ---- Channel-attention MLP + classifier (lane-dense, padded) -------------
    h1 = _gelu_exact(
        jnp.dot(gap, w1_ref[...], preferred_element_type=jnp.float32)
        + b1_ref[...])                                    # (TB, crp)
    y = jax.nn.sigmoid(
        jnp.dot(h1, w2_ref[...], preferred_element_type=jnp.float32)
        + b2_ref[...])                                    # (TB, C)
    feat = gap * y                                        # (TB, C)
    o_ref[...] = (jnp.dot(feat, wl_ref[...], preferred_element_type=jnp.float32)
                  + bl_ref[...])                          # (TB, NC_pad)


# Targeted feature probe for single-buffered (grid-invariant) operands.
def _buffered_supported():
    if not hasattr(pl, "Buffered"):
        return False
    try:
        pl.BlockSpec((8, 128), lambda i: (i, 0), pipeline_mode=pl.Buffered(1))
        return True
    except TypeError:
        return False


_VMEM_LIMIT_BYTES = 48 << 20   # > v5e's 16 MiB default, < v7x's 64 MiB physical


def cls_boost_head(x, H, W, params):
    """x: (B, L, C) with L = H*W.  params hold transposed (in, out) weights."""
    B, L, C = x.shape
    assert L == H * W
    nc = params["wl"].shape[1]
    cr = params["w1"].shape[1]
    ncp = _round_up(nc, 128)     # lane-dense classifier output
    crp = _round_up(cr, 128)     # lane-dense squeeze-excite bottleneck

    # ---- Batch-block sizing against an explicit VMEM budget -------------------
    # Weights are grid-invariant; size them x2 to also cover the (rare)
    # double-buffered fallback.  x block is double-buffered, output block too.
    w_elems = C * C + C + C * crp + crp + crp * C + C + C * ncp + ncp
    weight_bytes = 2 * w_elems * 4
    per_row_bytes = 2 * (H * W * C * 4) + 2 * (ncp * 4)
    budget = int(_VMEM_LIMIT_BYTES * 0.85)
    tb_max = max(8, ((budget - weight_bytes) // per_row_bytes) // 8 * 8)

    if B <= 8:
        tb = B                                          # block == full batch dim
    else:
        # Multiple of 8 (legal (tb, ncp) out block) and >= 2 grid steps so both
        # v7x TensorCores get work via the "parallel" grid axis.
        tb = min(tb_max, _round_up(pl.cdiv(B, 2), 8))
    b_pad = _round_up(B, tb)

    x4 = x.reshape(B, H, W, C)
    # NOTE(perf): for production (HBM-bound) shapes, `x4 = x4.astype(jnp.bfloat16)`
    # halves the dominant x DMA; kept f32 here to stay inside the 1e-4 check.
    if b_pad != B:
        x4 = jnp.pad(x4, ((0, b_pad - B), (0, 0), (0, 0), (0, 0)))

    # Zero-pad bottleneck / class dims (exact: GELU(0)=0, padded w2 rows and
    # wl/bl columns are zero; padded columns are sliced off below).
    w1p = jnp.pad(params["w1"], ((0, 0), (0, crp - cr)))
    b1p = jnp.pad(params["b1"], ((0, 0), (0, crp - cr)))
    w2p = jnp.pad(params["w2"], ((0, crp - cr), (0, 0)))
    wlp = jnp.pad(params["wl"], ((0, 0), (0, ncp - nc)))
    blp = jnp.pad(params["bl"], ((0, 0), (0, ncp - nc)))

    args = (x4, params["wc"], params["bc"], w1p, b1p, w2p, params["b2"],
            wlp, blp)

    single_buffer = _buffered_supported()

    def wspec(shape):
        kwargs = {}
        if single_buffer:
            # Grid-invariant operands: no double buffering -> VMEM headroom.
            kwargs["pipeline_mode"] = pl.Buffered(1)
        return pl.BlockSpec(shape, lambda b: (0,) * len(shape), **kwargs)

    call = pl.pallas_call(
        cls_boost_head_kernel,
        out_shape=jax.ShapeDtypeStruct((b_pad, ncp), jnp.float32),
        grid=(b_pad // tb,),
        in_specs=[
            pl.BlockSpec((tb, H, W, C), lambda b: (b, 0, 0, 0)),  # x
            wspec((C, C)),      # wc  (1x1 conv weight, transposed)
            wspec((1, C)),      # bc
            wspec((C, crp)),    # w1
            wspec((1, crp)),    # b1
            wspec((crp, C)),    # w2
            wspec((1, C)),      # b2
            wspec((C, ncp)),    # wl
            wspec((1, ncp)),    # bl
        ],
        out_specs=pl.BlockSpec((tb, ncp), lambda b: (b, 0)),
        compiler_params=pltpu.CompilerParams(
            dimension_semantics=("parallel",),
            vmem_limit_bytes=_VMEM_LIMIT_BYTES),
    )
    out = call(*args)
    return out[:B, :nc]


def reference(x, H, W, p):
    # Pure-JAX reference mirroring the PyTorch forward (channels-last).
    B, L, C = x.shape
    xi = x.reshape(B, H, W, C)
    x_h = xi.mean(axis=2)                                # (B, H, C) pool over W
    x_w = xi.mean(axis=1)                                # (B, W, C) pool over H
    cat = jnp.concatenate([x_h, x_w], axis=1)            # (B, H+W, C)
    hw = cat @ p["wc"] + p["bc"]
    ah = jax.nn.sigmoid(hw[:, :H])                       # (B, H, C)
    aw = jax.nn.sigmoid(hw[:, H:])                       # (B, W, C)
    xw = xi * ah[:, :, None, :] * aw[:, None, :, :]
    gap = xw.mean(axis=(1, 2))                           # (B, C)
    h1 = jax.nn.gelu(gap @ p["w1"] + p["b1"], approximate=False)
    y = jax.nn.sigmoid(h1 @ p["w2"] + p["b2"])
    feat = gap * y
    return feat @ p["wl"] + p["bl"]


if __name__ == "__main__":
    B, H, W, C = 2, 8, 8, 32
    L = H * W
    ch_reduce = 16
    cr = C // ch_reduce
    num_classes = 10

    key = jax.random.PRNGKey(0)
    ks = jax.random.split(key, 9)
    f32 = jnp.float32
    params = {
        # Conv2d(C, C, 1) weight (C_out, C_in, 1, 1) stored transposed as (C_in, C_out).
        "wc": (jax.random.normal(ks[0], (C, C), f32) * (1.0 / jnp.sqrt(C))),
        "bc": (jax.random.normal(ks[1], (1, C), f32) * 0.1),
        # ch_attn: Linear(C, cr) -> GELU -> Linear(cr, C) -> Sigmoid (weights transposed).
        "w1": (jax.random.normal(ks[2], (C, cr), f32) * (1.0 / jnp.sqrt(C))),
        "b1": (jax.random.normal(ks[3], (1, cr), f32) * 0.1),
        "w2": (jax.random.normal(ks[4], (cr, C), f32) * (1.0 / jnp.sqrt(cr))),
        "b2": (jax.random.normal(ks[5], (1, C), f32) * 0.1),
        # Final Linear(C, num_classes), weight transposed.
        "wl": (jax.random.normal(ks[6], (C, num_classes), f32) * (1.0 / jnp.sqrt(C))),
        "bl": (jax.random.normal(ks[7], (1, num_classes), f32) * 0.1),
    }

    x = jax.random.normal(ks[8], (B, L, C), f32)

    out = cls_boost_head(x, H, W, params)
    out = jax.block_until_ready(out)

    ref = reference(x, H, W, params)
    assert out.shape == (B, num_classes)
    assert jnp.max(jnp.abs(out - ref)) < 1e-4, "mismatch vs pure-JAX reference"
    print("KERNEL_OK")
</pallas_src>

<mosaic_0001>
module attributes {stable_mosaic.version = 11 : i64} {
  func.func @cls_boost_head_kernel(%arg0: i32, %arg1: memref<2x8x8x32xf32, #tpu.memory_space<vmem>>, %arg2: memref<32x32xf32, #tpu.memory_space<vmem>>, %arg3: memref<1x32xf32, #tpu.memory_space<vmem>>, %arg4: memref<32x128xf32, #tpu.memory_space<vmem>>, %arg5: memref<1x128xf32, #tpu.memory_space<vmem>>, %arg6: memref<128x32xf32, #tpu.memory_space<vmem>>, %arg7: memref<1x32xf32, #tpu.memory_space<vmem>>, %arg8: memref<32x128xf32, #tpu.memory_space<vmem>>, %arg9: memref<1x128xf32, #tpu.memory_space<vmem>>, %arg10: memref<2x128xf32, #tpu.memory_space<vmem>>) attributes {dimension_semantics = [#tpu.dimension_semantics<parallel>], iteration_bounds = array<i64: 1>, scalar_prefetch = 0 : i64, scratch_operands = 0 : i64, tpu.core_type = #tpu.core_type<tc>, window_params = [{transform_indices = @transform_0, window_bounds = array<i64: 2, 8, 8, 32>}, {pipeline_mode = #tpu.pipeline_mode<synchronous>, transform_indices = @transform_1, window_bounds = array<i64: 32, 32>}, {pipeline_mode = #tpu.pipeline_mode<synchronous>, transform_indices = @transform_2, window_bounds = array<i64: 1, 32>}, {pipeline_mode = #tpu.pipeline_mode<synchronous>, transform_indices = @transform_3, window_bounds = array<i64: 32, 128>}, {pipeline_mode = #tpu.pipeline_mode<synchronous>, transform_indices = @transform_4, window_bounds = array<i64: 1, 128>}, {pipeline_mode = #tpu.pipeline_mode<synchronous>, transform_indices = @transform_5, window_bounds = array<i64: 128, 32>}, {pipeline_mode = #tpu.pipeline_mode<synchronous>, transform_indices = @transform_6, window_bounds = array<i64: 1, 32>}, {pipeline_mode = #tpu.pipeline_mode<synchronous>, transform_indices = @transform_7, window_bounds = array<i64: 32, 128>}, {pipeline_mode = #tpu.pipeline_mode<synchronous>, transform_indices = @transform_8, window_bounds = array<i64: 1, 128>}, {transform_indices = @transform_9, window_bounds = array<i64: 2, 128>}]} {
    %c0 = arith.constant 0 : index
    %c0_0 = arith.constant 0 : index
    %c0_1 = arith.constant 0 : index
    %c0_2 = arith.constant 0 : index
    %0 = vector.load %arg1[%c0, %c0_0, %c0_1, %c0_2] : memref<2x8x8x32xf32, #tpu.memory_space<vmem>>, vector<2x8x8x32xf32>
    %cst = arith.constant dense<0.000000e+00> : vector<2x8x32xf32>
    %1 = vector.multi_reduction <add>, %0, %cst [2] : vector<2x8x8x32xf32> to vector<2x8x32xf32>
    %cst_3 = arith.constant 1.250000e-01 : f32
    %2 = vector.broadcast %cst_3 : f32 to vector<2x8x32xf32>
    %3 = arith.mulf %1, %2 : vector<2x8x32xf32>
    %cst_4 = arith.constant dense<0.000000e+00> : vector<2x8x32xf32>
    %4 = vector.multi_reduction <add>, %0, %cst_4 [1] : vector<2x8x8x32xf32> to vector<2x8x32xf32>
    %cst_5 = arith.constant 1.250000e-01 : f32
    %5 = vector.broadcast %cst_5 : f32 to vector<2x8x32xf32>
    %6 = arith.mulf %4, %5 : vector<2x8x32xf32>
    %7 = vector.shape_cast %3 : vector<2x8x32xf32> to vector<16x32xf32>
    %8 = vector.shape_cast %6 : vector<2x8x32xf32> to vector<16x32xf32>
    %9 = tpu.concatenate %7, %8 in 0 : vector<16x32xf32>, vector<16x32xf32> -> vector<32x32xf32>
    %c0_6 = arith.constant 0 : index
    %c0_7 = arith.constant 0 : index
    %10 = vector.load %arg2[%c0_6, %c0_7] : memref<32x32xf32, #tpu.memory_space<vmem>>, vector<32x32xf32>
    %cst_8 = arith.constant dense<0.000000e+00> : vector<32x32xf32>
    %11 = tpu.matmul %9, %10, %cst_8 {dimension_numbers = #tpu.dot_dimension_numbers<[1], [0], [0], [1], [0, 0, 1, 1], [], []>} : vector<32x32xf32>, vector<32x32xf32>, vector<32x32xf32> -> vector<32x32xf32>
    %c0_9 = arith.constant 0 : index
    %c0_10 = arith.constant 0 : index
    %12 = vector.load %arg3[%c0_9, %c0_10] : memref<1x32xf32, #tpu.memory_space<vmem>>, vector<1x32xf32>
    %13 = vector.broadcast %12 : vector<1x32xf32> to vector<32x32xf32>
    %14 = arith.addf %11, %13 : vector<32x32xf32>
    %15 = arith.negf %14 : vector<32x32xf32>
    %16 = math.exp %15 : vector<32x32xf32>
    %cst_11 = arith.constant 1.000000e+00 : f32
    %17 = vector.broadcast %cst_11 : f32 to vector<32x32xf32>
    %18 = arith.addf %17, %16 : vector<32x32xf32>
    %19 = arith.divf %17, %18 : vector<32x32xf32>
    %20 = vector.extract_strided_slice %19 {offsets = [0, 0], sizes = [16, 32], strides = [1, 1]} : vector<32x32xf32> to vector<16x32xf32>
    %21 = vector.shape_cast %20 : vector<16x32xf32> to vector<2x8x32xf32>
    %22 = vector.extract_strided_slice %19 {offsets = [16, 0], sizes = [16, 32], strides = [1, 1]} : vector<32x32xf32> to vector<16x32xf32>
    %23 = vector.shape_cast %22 : vector<16x32xf32> to vector<2x8x32xf32>
    %24 = vector.shape_cast %23 : vector<2x8x32xf32> to vector<2x1x8x32xf32>
    %25 = vector.broadcast %24 : vector<2x1x8x32xf32> to vector<2x8x8x32xf32>
    %26 = arith.mulf %0, %25 : vector<2x8x8x32xf32>
    %cst_12 = arith.constant dense<0.000000e+00> : vector<2x8x32xf32>
    %27 = vector.multi_reduction <add>, %26, %cst_12 [2] : vector<2x8x8x32xf32> to vector<2x8x32xf32>
    %28 = arith.mulf %21, %27 : vector<2x8x32xf32>
    %cst_13 = arith.constant dense<0.000000e+00> : vector<2x32xf32>
    %29 = vector.multi_reduction <add>, %28, %cst_13 [1] : vector<2x8x32xf32> to vector<2x32xf32>
    %cst_14 = arith.constant 1.562500e-02 : f32
    %30 = vector.broadcast %cst_14 : f32 to vector<2x32xf32>
    %31 = arith.mulf %29, %30 : vector<2x32xf32>
    %c0_15 = arith.constant 0 : index
    %c0_16 = arith.constant 0 : index
    %32 = vector.load %arg4[%c0_15, %c0_16] : memref<32x128xf32, #tpu.memory_space<vmem>>, vector<32x128xf32>
    %cst_17 = arith.constant dense<0.000000e+00> : vector<2x128xf32>
    %33 = tpu.matmul %31, %32, %cst_17 {dimension_numbers = #tpu.dot_dimension_numbers<[1], [0], [0], [1], [0, 0, 1, 1], [], []>} : vector<2x32xf32>, vector<32x128xf32>, vector<2x128xf32> -> vector<2x128xf32>
    %c0_18 = arith.constant 0 : index
    %c0_19 = arith.constant 0 : index
    %34 = vector.load %arg5[%c0_18, %c0_19] : memref<1x128xf32, #tpu.memory_space<vmem>>, vector<1x128xf32>
    %35 = vector.broadcast %34 : vector<1x128xf32> to vector<2x128xf32>
    %36 = arith.addf %33, %35 : vector<2x128xf32>
    %cst_20 = arith.constant 5.000000e-01 : f32
    %37 = vector.broadcast %cst_20 : f32 to vector<2x128xf32>
    %38 = arith.mulf %37, %36 : vector<2x128xf32>
    %cst_21 = arith.constant 0.707106769 : f32
    %39 = vector.broadcast %cst_21 : f32 to vector<2x128xf32>
    %40 = arith.mulf %36, %39 : vector<2x128xf32>
    %41 = math.erf %40 : vector<2x128xf32>
    %cst_22 = arith.constant 1.000000e+00 : f32
    %42 = vector.broadcast %cst_22 : f32 to vector<2x128xf32>
    %43 = arith.addf %42, %41 : vector<2x128xf32>
    %44 = arith.mulf %38, %43 : vector<2x128xf32>
    %c0_23 = arith.constant 0 : index
    %c0_24 = arith.constant 0 : index
    %45 = vector.load %arg6[%c0_23, %c0_24] : memref<128x32xf32, #tpu.memory_space<vmem>>, vector<128x32xf32>
    %cst_25 = arith.constant dense<0.000000e+00> : vector<2x32xf32>
    %46 = tpu.matmul %44, %45, %cst_25 {dimension_numbers = #tpu.dot_dimension_numbers<[1], [0], [0], [1], [0, 0, 1, 1], [], []>} : vector<2x128xf32>, vector<128x32xf32>, vector<2x32xf32> -> vector<2x32xf32>
    %c0_26 = arith.constant 0 : index
    %c0_27 = arith.constant 0 : index
    %47 = vector.load %arg7[%c0_26, %c0_27] : memref<1x32xf32, #tpu.memory_space<vmem>>, vector<1x32xf32>
    %48 = vector.broadcast %47 : vector<1x32xf32> to vector<2x32xf32>
    %49 = arith.addf %46, %48 : vector<2x32xf32>
    %50 = arith.negf %49 : vector<2x32xf32>
    %51 = math.exp %50 : vector<2x32xf32>
    %cst_28 = arith.constant 1.000000e+00 : f32
    %52 = vector.broadcast %cst_28 : f32 to vector<2x32xf32>
    %53 = arith.addf %52, %51 : vector<2x32xf32>
    %54 = arith.divf %52, %53 : vector<2x32xf32>
    %55 = arith.mulf %31, %54 : vector<2x32xf32>
    %c0_29 = arith.constant 0 : index
    %c0_30 = arith.constant 0 : index
    %56 = vector.load %arg8[%c0_29, %c0_30] : memref<32x128xf32, #tpu.memory_space<vmem>>, vector<32x128xf32>
    %cst_31 = arith.constant dense<0.000000e+00> : vector<2x128xf32>
    %57 = tpu.matmul %55, %56, %cst_31 {dimension_numbers = #tpu.dot_dimension_numbers<[1], [0], [0], [1], [0, 0, 1, 1], [], []>} : vector<2x32xf32>, vector<32x128xf32>, vector<2x128xf32> -> vector<2x128xf32>
    %c0_32 = arith.constant 0 : index
    %c0_33 = arith.constant 0 : index
    %58 = vector.load %arg9[%c0_32, %c0_33] : memref<1x128xf32, #tpu.memory_space<vmem>>, vector<1x128xf32>
    %59 = vector.broadcast %58 : vector<1x128xf32> to vector<2x128xf32>
    %60 = arith.addf %57, %59 : vector<2x128xf32>
    %c0_34 = arith.constant 0 : index
    %c0_35 = arith.constant 0 : index
    %61 = vector.load %arg10[%c0_34, %c0_35] : memref<2x128xf32, #tpu.memory_space<vmem>>, vector<2x128xf32>
    tpu.vector_store %arg10[%c0_34, %c0_35], %60 {strides = array<i32>} : memref<2x128xf32, #tpu.memory_space<vmem>>, vector<2x128xf32>,
    return
  }
  func.func @transform_0(%arg0: i32) -> (i32, i32, i32, i32) {
    %c0_i32 = arith.constant 0 : i32
    %c0_i32_0 = arith.constant 0 : i32
    %c0_i32_1 = arith.constant 0 : i32
    %c0_i32_2 = arith.constant 0 : i32
    return %arg0, %c0_i32, %c0_i32_0, %c0_i32_1 : i32, i32, i32, i32
  }
  func.func @transform_1(%arg0: i32) -> (i32, i32) {
    %c0_i32 = arith.constant 0 : i32
    %c0_i32_0 = arith.constant 0 : i32
    %c0_i32_1 = arith.constant 0 : i32
    return %c0_i32, %c0_i32_0 : i32, i32
  }
  func.func @transform_2(%arg0: i32) -> (i32, i32) {
    %c0_i32 = arith.constant 0 : i32
    %c0_i32_0 = arith.constant 0 : i32
    %c0_i32_1 = arith.constant 0 : i32
    return %c0_i32, %c0_i32_0 : i32, i32
  }
  func.func @transform_3(%arg0: i32) -> (i32, i32) {
    %c0_i32 = arith.constant 0 : i32
    %c0_i32_0 = arith.constant 0 : i32
    %c0_i32_1 = arith.constant 0 : i32
    return %c0_i32, %c0_i32_0 : i32, i32
  }
  func.func @transform_4(%arg0: i32) -> (i32, i32) {
    %c0_i32 = arith.constant 0 : i32
    %c0_i32_0 = arith.constant 0 : i32
    %c0_i32_1 = arith.constant 0 : i32
    return %c0_i32, %c0_i32_0 : i32, i32
  }
  func.func @transform_5(%arg0: i32) -> (i32, i32) {
    %c0_i32 = arith.constant 0 : i32
    %c0_i32_0 = arith.constant 0 : i32
    %c0_i32_1 = arith.constant 0 : i32
    return %c0_i32, %c0_i32_0 : i32, i32
  }
  func.func @transform_6(%arg0: i32) -> (i32, i32) {
    %c0_i32 = arith.constant 0 : i32
    %c0_i32_0 = arith.constant 0 : i32
    %c0_i32_1 = arith.constant 0 : i32
    return %c0_i32, %c0_i32_0 : i32, i32
  }
  func.func @transform_7(%arg0: i32) -> (i32, i32) {
    %c0_i32 = arith.constant 0 : i32
    %c0_i32_0 = arith.constant 0 : i32
    %c0_i32_1 = arith.constant 0 : i32
    return %c0_i32, %c0_i32_0 : i32, i32
  }
  func.func @transform_8(%arg0: i32) -> (i32, i32) {
    %c0_i32 = arith.constant 0 : i32
    %c0_i32_0 = arith.constant 0 : i32
    %c0_i32_1 = arith.constant 0 : i32
    return %c0_i32, %c0_i32_0 : i32, i32
  }
  func.func @transform_9(%arg0: i32) -> (i32, i32) {
    %c0_i32 = arith.constant 0 : i32
    %c0_i32_0 = arith.constant 0 : i32
    return %arg0, %c0_i32 : i32, i32
  }
}

</mosaic_0001>

<bundles_post_ra>
// kernel: tpu_custom_call.1
= control target key start
LH: loop header
LB: loop body
LE: loop exit
PB: predicated region body
PF: predicated region fallthrough
CT: control target
= control target key end

     0   :  { %14 = vsyncpa [#allocation3], 0  ;;  %s1353_s0 = inlined_call_operand.vmem [shape: f32[2,8,8,32], index: 0, kind: input, shape index: {}]   ;;  %s1354_s1 = inlined_call_operand.vmem [shape: f32[32,32], index: 1, kind: input, shape index: {}]   ;;  %s1355_s2 = inlined_call_operand.vmem [shape: f32[1,32], index: 2, kind: input, shape index: {}]   ;;  %s1356_s3 = inlined_call_operand.hbm [shape: f32[32,128], index: 3, kind: input, shape index: {}]   ;;  %s1357_s4 = inlined_call_operand.vmem [shape: f32[1,128], index: 4, kind: input, shape index: {}]   ;;  %s1358_s5 = inlined_call_operand.vmem [shape: f32[128,32], index: 5, kind: input, shape index: {}]   ;;  %s1359_s6 = inlined_call_operand.vmem [shape: f32[1,32], index: 6, kind: input, shape index: {}]   ;;  %s1360_s7 = inlined_call_operand.hbm [shape: f32[32,128], index: 7, kind: input, shape index: {}]   ;;  %s1361_s8 = inlined_call_operand.vmem [shape: f32[1,128], index: 8, kind: input, shape index: {}]   ;;  %s1362_s9 = inlined_call_operand.hbm [shape: f32[2,128], index: 9, kind: output, shape index: {}]  }
   0x1   :  { %15 = vsyncpa [#allocation6], 0 }
   0x2   :  { %16 = vsyncpa [#allocation4], 0  ;;  %s27_s11 = sshll.u32 %s1356_s3, 4  ;;  %s884_s12 = smov [#allocation2]   ;;  %s28_s11 = int_to_ptr.hbm [resolvable:$true] %s27_s11 }
   0x3   :  { %s29_s13 = sshll.u32 %s884_s12, 4  ;;  %s46_s16 = sshll.u32 %s1360_s7, 4  ;;  %s30_s13 = int_to_ptr.vmem [resolvable:$true] %s29_s13  ;;  %s47_s16 = int_to_ptr.hbm [resolvable:$true] %s46_s16 }
   0x4   :  { %s885_s17 = smov 128   ;;  %s886_s18 = smov 8  }
   0x5   :  { %35 = dma.hbm_to_vmem [thread:$0]  %s28_s11, 512, %s30_s13, [#allocation3], %s885_s17, %s885_s17, %s886_s18  }
   0x6   :  { %s887_s19 = smov [#allocation5]  }
   0x7   :  { %s48_s20 = sshll.u32 %s887_s19, 4  ;;  %s49_s20 = int_to_ptr.vmem [resolvable:$true] %s48_s20 }
   0x8   :  { %54 = dma.hbm_to_vmem [thread:$0]  %s47_s16, 512, %s49_s20, [#allocation6], %s885_s17, %s885_s17, %s886_s18  }
   0x9   :  { %878 = dma.done.wait [#allocation3], 512  }
   0xa   :  { %879 = vsyncadd [#allocation3], 4294966784 }
   0xb   :  { %880 = dma.done.wait [#allocation6], 512  }
   0xc   :  { %881 = vsyncadd [#allocation6], 4294966784  ;;  %vm81_vm0 = vcmask 261120   ;;  %v266_v0 = vld [vmem:[%s1354_s1 + $0x18] sm:$0xff]  ;;  %v265_v1 = vld [vmem:[%s1354_s1 + $0x10] sm:$0xff]  ;;  %vm242_vm1 = vcmask 1041409  }
   0xd   :  { %771 = vmatpush.msra.mxu1 %v266_v0  ;;  %v264_v2 = vld [vmem:[%s1354_s1 + $0x8] sm:$0xff]  ;;  %293 = vmatpush.msra.mxu0 %v266_v0  ;;  %v957_v3 = vld [vmem:[%s1353_s0 + $0x40] sm:$0xff]  ;;  %v967_v5 = vld [vmem:[%s1353_s0 + $0x50] sm:$0xff]  ;;  %vm244_vm2 = vcmask 1042434   ;;  %vm246_vm3 = vcmask 1043459   ;;  %vm248_vm4 = vcmask 1044484  }
   0xe   :  { %v962_v4 = vld [vmem:[%s1353_s0 + $0x48] sm:$0xff]  ;;  %v972_v6 = vld [vmem:[%s1353_s0 + $0x58] sm:$0xff]  ;;  %v977_v7 = vld [vmem:[%s1353_s0 + $0x60] sm:$0xff]  ;;  %v138_v8 = vsel %vm81_vm0, %v957_v3, 0.0  ;;  %v152_v15 = vsel %vm81_vm0, %v967_v5, 0.0  ;;  %vm250_vm5 = vcmask 1045509  }
   0xf   :  { %v145_v9 = vsel %vm81_vm0, %v962_v4, 0.0  ;;  %772 = vmatpush.msra.mxu1 %v265_v1  ;;  %294 = vmatpush.msra.mxu0 %v265_v1  ;;  %v986_v10 = vld [vmem:[%s1353_s0 + $0x68] sm:$0xff]  ;;  %v991_v11 = vld [vmem:[%s1353_s0 + $0x70] sm:$0xff]  ;;  %v996_v12 = vld [vmem:[%s1353_s0 + $0x78] sm:$0xff]  ;;  %v139_v13 = vrot.slane %v138_v8, 4  ;;  %v153_v18 = vrot.slane %v152_v15, 4 }
  0x10   :  { %v146_v14 = vrot.slane %v145_v9, 4  ;;  %v217_v16 = vadd.f32 %v145_v9, %v138_v8  ;;  %v263_v17 = vld [vmem:[%s1354_s1] sm:$0xff]  ;;  %v159_v19 = vsel %vm81_vm0, %v972_v6, 0.0  ;;  %v166_v20 = vsel %vm81_vm0, %v977_v7, 0.0  ;;  %v1027_v31 = vld [vmem:[%s1353_s0 + $0x8] sm:$0xff]  ;;  %v1032_v32 = vld [vmem:[%s1353_s0 + $0x10] sm:$0xff] }
  0x11   :  { %v173_v21 = vsel %vm81_vm0, %v986_v10, 0.0  ;;  %773 = vmatpush.msra.mxu1 %v264_v2  ;;  %v1009_v22 = vadd.f32 %v139_v13, %v138_v8  ;;  %v160_v24 = vrot.slane %v159_v19, 4  ;;  %v167_v25 = vrot.slane %v166_v20, 4  ;;  %295 = vmatpush.msra.mxu0 %v264_v2  ;;  %v1022_v30 = vld [vmem:[%s1353_s0] sm:$0xff]  ;;  %v1046_v41 = vld [vmem:[%s1353_s0 + $0x18] sm:$0xff]  ;;  %v1067_v50 = vld [vmem:[%s1353_s0 + $0x28] sm:$0xff] }
  0x12   :  { %v1011_v23 = vadd.f32 %v146_v14, %v145_v9  ;;  %v1013_v26 = vadd.f32 %v153_v18, %v152_v15  ;;  %v174_v27 = vrot.slane %v173_v21, 4  ;;  %v180_v28 = vsel %vm81_vm0, %v991_v11, 0.0  ;;  %v1062_v49 = vld [vmem:[%s1353_s0 + $0x20] sm:$0xff]  ;;  %v1072_v51 = vld [vmem:[%s1353_s0 + $0x30] sm:$0xff]  ;;  %s888_s21 = smov [#allocation7]   ;;  %s748_s7 = sshll.u32 %s1362_s9, 4  ;;  %s749_s7 = int_to_ptr.hbm [resolvable:$true] %s748_s7 }
  0x13   :  { %v187_v29 = vsel %vm81_vm0, %v996_v12, 0.0  ;;  %774 = vmatpush.msra.mxu1 %v263_v17  ;;  %v141_v33 = vrot.slane %v1009_v22, 2  ;;  %v1036_v35 = vadd.f32 %v160_v24, %v159_v19  ;;  %v1038_v36 = vadd.f32 %v167_v25, %v166_v20  ;;  %296 = vmatpush.msra.mxu0 %v263_v17 }
  0x14   :  { %v148_v34 = vrot.slane %v1011_v23, 2  ;;  %v155_v37 = vrot.slane %v1013_v26, 2  ;;  %v1041_v38 = vadd.f32 %v174_v27, %v173_v21  ;;  %v181_v39 = vrot.slane %v180_v28, 4 }
  0x15   :  { %v188_v40 = vrot.slane %v187_v29, 4  ;;  %v162_v42 = vrot.slane %v1036_v35, 2  ;;  %v169_v43 = vrot.slane %v1038_v36, 2  ;;  %v218_v44 = vadd.f32 %v217_v16, %v152_v15 }
  0x16   :  { %v1052_v45 = vsel %vm81_vm0, %v1022_v30, 0.0  ;;  %v1055_v47 = vadd.f32 %v181_v39, %v180_v28  ;;  %v1077_v54 = vsel %vm81_vm0, %v1027_v31, 0.0  ;;  %v1081_v55 = vsel %vm81_vm0, %v1032_v32, 0.0 }
  0x17   :  { %v1057_v48 = vadd.f32 %v188_v40, %v187_v29  ;;  %v83_v52 = vrot.slane %v1052_v45, 4  ;;  %v219_v53 = vadd.f32 %v218_v44, %v159_v19  ;;  %v1085_v56 = vsel %vm81_vm0, %v1046_v41, 0.0 }
  0x18   :  { %v90_v58 = vrot.slane %v1077_v54, 4  ;;  %v97_v59 = vrot.slane %v1081_v55, 4  ;;  %v104_v60 = vrot.slane %v1085_v56, 4  ;;  %v1093_v62 = vsel %vm81_vm0, %v1062_v49, 0.0 }
  0x19   :  { %v84_v57 = vadd.f32 %v83_v52, %v1052_v45  ;;  %v220_v61 = vadd.f32 %v219_v53, %v166_v20  ;;  %v1097_v63 = vsel %vm81_vm0, %v1067_v50, 0.0  ;;  %v1101_v0 = vsel %vm81_vm0, %v1072_v51, 0.0 }
  0x1a   :  { %v91_v2 = vadd.f32 %v90_v58, %v1077_v54  ;;  %v98_v8 = vadd.f32 %v97_v59, %v1081_v55  ;;  %v105_v9 = vadd.f32 %v104_v60, %v1085_v56  ;;  %v111_v14 = vrot.slane %v1093_v62, 4 }
  0x1b   :  { %v85_v1 = vrot.slane %v84_v57, 2  ;;  %v221_v13 = vadd.f32 %v220_v61, %v173_v21  ;;  %v118_v15 = vrot.slane %v1097_v63, 4  ;;  %v125_v16 = vrot.slane %v1101_v0, 4 }
  0x1c   :  { %v92_v18 = vrot.slane %v91_v2, 2  ;;  %v99_v19 = vrot.slane %v98_v8, 2  ;;  %v106_v20 = vrot.slane %v105_v9, 2  ;;  %v112_v25 = vadd.f32 %v111_v14, %v1093_v62 }
  0x1d   :  { %v86_v17 = vadd.f32 %v85_v1, %v84_v57  ;;  %v222_v24 = vadd.f32 %v221_v13, %v180_v28  ;;  %v119_v27 = vadd.f32 %v118_v15, %v1097_v63  ;;  %v126_v39 = vadd.f32 %v125_v16, %v1101_v0  ;;  %v1115_v57 = vld [vmem:[%s1353_s0 + $0x38] sm:$0xff] }
  0x1e   :  { %v93_v40 = vadd.f32 %v92_v18, %v91_v2  ;;  %v100_v44 = vadd.f32 %v99_v19, %v98_v8  ;;  %v107_v52 = vadd.f32 %v106_v20, %v105_v9  ;;  %v113_v58 = vrot.slane %v112_v25, 2 }
  0x1f   :  { %v87_v21 = vrot.slane %v86_v17, 1  ;;  %v223_v53 = vadd.f32 %v222_v24, %v187_v29  ;;  %v120_v28 = vrot.slane %v119_v27, 2  ;;  %v127_v59 = vrot.slane %v126_v39, 2 }
  0x20   :  { %v94_v61 = vrot.slane %v93_v40, 1  ;;  %v101_v1 = vrot.slane %v100_v44, 1  ;;  %v108_v13 = vrot.slane %v107_v52, 1  ;;  %v114_v2 = vadd.f32 %v113_v58, %v112_v25 }
  0x21   :  { %v88_v60 = vadd.f32 %v87_v21, %v86_v17  ;;  %v225_v14 = vmul.f32 0.125, %v223_v53  ;;  %v121_v8 = vadd.f32 %v120_v28, %v119_v27  ;;  %v128_v9 = vadd.f32 %v127_v59, %v126_v39 }
  0x22   :  { %v95_v15 = vadd.f32 %v94_v61, %v93_v40  ;;  %v102_v29 = vadd.f32 %v101_v1, %v100_v44  ;;  %v109_v16 = vadd.f32 %v108_v13, %v107_v52  ;;  %v1119_v18 = vsel %vm81_vm0, %v1115_v57, 0.0 }
  0x23   :  { %762 = vmatmul.msk.f32.vlgmr.msra.gmra.mxu1 %vm81_vm0, %v225_v14  ;;  %v115_v19 = vrot.slane %v114_v2, 1  ;;  %v122_v20 = vrot.slane %v121_v8, 1  ;;  %v129_v17 = vrot.slane %v128_v9, 1  ;;  %v132_v24 = vrot.slane %v1119_v18, 4 }
  0x24   :  { %v194_v21 = vmul.f32 0.125, %v88_v60  ;;  %v195_v46 = vmul.f32 0.125, %v95_v15  ;;  %v196_v53 = vmul.f32 0.125, %v102_v29  ;;  %v197_v25 = vmul.f32 0.125, %v109_v16 }
  0x25   :  { %v116_v27 = vadd.f32 %v115_v19, %v114_v2  ;;  %v123_v39 = vadd.f32 %v122_v20, %v121_v8  ;;  %v130_v40 = vadd.f32 %v129_v17, %v128_v9  ;;  %v133_v44 = vadd.f32 %v132_v24, %v1119_v18 }
  0x26   :  { %v243_v52 = vsel %vm242_vm1, %v195_v46, %v194_v21  ;;  %vm252_vm6 = vcmask 1046534   ;;  %vm254_vm7 = vcmask 1047559   ;;  %v142_v58 = vadd.f32 %v141_v33, %v1009_v22 }
  0x27   :  { %v134_v28 = vrot.slane %v133_v44, 2  ;;  %v198_v59 = vmul.f32 0.125, %v116_v27  ;;  %v199_v61 = vmul.f32 0.125, %v123_v39  ;;  %v200_v60 = vmul.f32 0.125, %v130_v40 }
  0x28   :  { %v245_v1 = vsel %vm244_vm2, %v196_v53, %v243_v52  ;;  %v143_v13 = vrot.slane %v142_v58, 1  ;;  %v149_v14 = vadd.f32 %v148_v34, %v1011_v23  ;;  %v156_v46 = vadd.f32 %v155_v37, %v1013_v26 }
  0x29   :  { %v135_v2 = vadd.f32 %v134_v28, %v133_v44  ;;  %v247_v8 = vsel %vm246_vm3, %v197_v25, %v245_v1  ;;  %v163_v22 = vadd.f32 %v162_v42, %v1036_v35  ;;  %v170_v33 = vadd.f32 %v169_v43, %v1038_v36 }
  0x2a   :  { %v249_v9 = vsel %vm248_vm4, %v198_v59, %v247_v8  ;;  %v144_v15 = vadd.f32 %v143_v13, %v142_v58  ;;  %v150_v29 = vrot.slane %v149_v14, 1  ;;  %v157_v23 = vrot.slane %v156_v46, 1 }
  0x2b   :  { %v136_v34 = vrot.slane %v135_v2, 1  ;;  %v251_v16 = vsel %vm250_vm5, %v199_v61, %v249_v9  ;;  %v164_v26 = vrot.slane %v163_v22, 1  ;;  %v171_v37 = vrot.slane %v170_v33, 1 }
  0x2c   :  { %v253_v19 = vsel %vm252_vm6, %v200_v60, %v251_v16  ;;  %v151_v20 = vadd.f32 %v150_v29, %v149_v14  ;;  %v158_v17 = vadd.f32 %v157_v23, %v156_v46  ;;  %v1363_v35 = vrot.slane %v1041_v38, 2 }
  0x2d   :  { %v137_v24 = vadd.f32 %v136_v34, %v135_v2  ;;  %v165_v36 = vadd.f32 %v164_v26, %v163_v22  ;;  %v172_v43 = vadd.f32 %v171_v37, %v170_v33  ;;  %v183_v21 = vrot.slane %v1055_v47, 2 }
  0x2e   :  { %v177_v42 = vadd.f32 %v1363_v35, %v1041_v38  ;;  %v190_v25 = vrot.slane %v1057_v48, 2  ;;  %v202_v27 = vmul.f32 0.125, %v144_v15  ;;  %v203_v39 = vmul.f32 0.125, %v151_v20 }
  0x2f   :  { %v201_v40 = vmul.f32 0.125, %v137_v24  ;;  %v184_v44 = vadd.f32 %v183_v21, %v1055_v47  ;;  %v204_v52 = vmul.f32 0.125, %v158_v17  ;;  %v205_v58 = vmul.f32 0.125, %v165_v36 }
  0x30   :  { %v178_v53 = vrot.slane %v177_v42, 1  ;;  %v191_v59 = vadd.f32 %v190_v25, %v1057_v48  ;;  %v206_v61 = vmul.f32 0.125, %v172_v43  ;;  %v256_v38 = vsel %vm242_vm1, %v203_v39, %v202_v27 }
  0x31   :  { %v255_v60 = vsel %vm254_vm7, %v201_v40, %v253_v19  ;;  %v185_v1 = vrot.slane %v184_v44, 1  ;;  %v257_v13 = vsel %vm244_vm2, %v204_v52, %v256_v38  ;;  %v210_v14 = vadd.f32 %v1077_v54, %v1052_v45 }
  0x32   :  { %v179_v28 = vadd.f32 %v178_v53, %v177_v42  ;;  %759 = vmatmul.msk.f32.vlgmr.msra.gmra.mxu0 %vm81_vm0, %v255_v60  ;;  %v192_v46 = vrot.slane %v191_v59, 1  ;;  %v258_v2 = vsel %vm246_vm3, %v205_v58, %v257_v13 }
  0x33   :  { %v186_v8 = vadd.f32 %v185_v1, %v184_v44  ;;  %v259_v48 = vsel %vm248_vm4, %v206_v61, %v258_v2  ;;  %v211_v22 = vadd.f32 %v210_v14, %v1081_v55 }
  0x34   :  { %v207_v47 = vmul.f32 0.125, %v179_v28  ;;  %v193_v33 = vadd.f32 %v192_v46, %v191_v59 }
  0x35   :  { %v208_v15 = vmul.f32 0.125, %v186_v8  ;;  %v212_v29 = vadd.f32 %v211_v22, %v1085_v56  ;;  %v780_v56 = vld [vmem:[%s1355_s2] ss:$0 sm:$0xff] }
  0x36   :  { %v260_v9 = vsel %vm250_vm5, %v207_v47, %v259_v48  ;;  %v209_v23 = vmul.f32 0.125, %v193_v33 }
  0x37   :  { %v261_v45 = vsel %vm252_vm6, %v208_v15, %v260_v9  ;;  %v213_v54 = vadd.f32 %v212_v29, %v1093_v62  ;;  %v567_v15 = vld [vmem:[#allocation2 + $0x18] sm:$0xff]  ;;  %v566_v29 = vld [vmem:[#allocation2 + $0x10] sm:$0xff] }
  0x38   :  { %v262_v34 = vsel %vm254_vm7, %v209_v23, %v261_v45  ;;  %589 = vmatpush.msrb.mxu1 %v567_v15 }
  0x39   :  { %v214_v16 = vadd.f32 %v213_v54, %v1097_v63 }
  0x3a   :  { %760 = vmatmul.msk.f32.gmra.mxu0 %vm81_vm0, %v262_v34  ;;  %590 = vmatpush.msrb.mxu1 %v566_v29 }
  0x3b   :  { %v215_v26 = vadd.f32 %v214_v16, %v1101_v0  ;;  %v565_v16 = vld [vmem:[#allocation2 + $0x8] sm:$0xff] }
  0x3c   :  { %591 = vmatpush.msrb.mxu1 %v565_v16 }
  0x3d   :  { %v216_v55 = vadd.f32 %v215_v26, %v1119_v18 }
  0x3f   :  { %v224_v37 = vmul.f32 0.125, %v216_v55 }
  0x42   :  { %761 = vmatmul.msk.f32.gmra.mxu0 %vm81_vm0, %v224_v37 }
  0xa0   :  { %v307_v19 = vpop.f32.mrf.mxu1 }
  0xa1   :  { %v308_v20 = vadd.f32 %v780_v56, %v307_v19 }
  0xa3   :  { %v766_v62 = vmul.f32 -1.442695, %v308_v20  ;;  %v564_v20 = vld [vmem:[#allocation2] sm:$0xff] }
  0xa4   :  { %592 = vmatpush.msrb.mxu1 %v564_v20 }
  0xa5   :  { %784 = vpow2.f32 %v766_v62 }
  0xab   :  { %v785_v17 = vpop.eup %784 }
  0xac   :  { %v325_v35 = vadd.f32 1.0, %v785_v17 }
  0xae   :  { %786 = vrcp.f32 %v325_v35  ;;  %v382_v0 = vand.u32 2147483648, %v325_v35  ;;  %vm376_vm8 = vweird.f32 %v325_v35  ;;  %v380_v43 = vand.u32 2147483647, %v325_v35 }
  0xaf   :  { %v298_v63 = vpop.f32.mrf.mxu0 }
  0xb0   :  { %v299_v36 = vadd.f32 %v780_v56, %v298_v63  ;;  %v383_v27 = vor.u32 1.1754944e-38, %v382_v0  ;;  %vm381_vm11 = vcmp.eq.f32.partialorder %v380_v43, 8.507059e+37 }
  0xb2   :  { %v763_v39 = vmul.f32 -1.442695, %v299_v36 }
  0xb4   :  { %v787_v42 = vpop.eup %786 }
  0xb5   :  { %v372_v24 = vmul.f32 %v787_v42, %v325_v35  ;;  %vm377_vm9 = vweird.f32 %v787_v42 }
  0xb6   :  { %vm378_vm10 = vmor %vm376_vm8, %vm377_vm9 }
  0xb7   :  { %v373_v18 = vsub.f32 1.0, %v372_v24  ;;  %v301_v21 = vpop.f32.mrf.mxu0 }
  0xb8   :  { %v302_v53 = vadd.f32 %v780_v56, %v301_v21 }
  0xb9   :  { %v374_v25 = vmul.f32 %v787_v42, %v373_v18 }
  0xba   :  { %v764_v40 = vmul.f32 -1.442695, %v302_v53 }
  0xbb   :  { %v375_v44 = vadd.f32 %v787_v42, %v374_v25 }
  0xbc   :  { %788 = vpow2.f32 %v764_v40 }
  0xbd   :  { %v379_v52 = vsel %vm378_vm10, %v787_v42, %v375_v44  ;;  %790 = vpow2.f32 %v763_v39 }
  0xbe   :  { %v384_v58 = vsel %vm381_vm11, %v383_v27, %v379_v52 }
  0xbf   :  { %v394_v28 = vmul.f32 %v384_v58, %v957_v3  ;;  %v395_v59 = vmul.f32 %v384_v58, %v962_v4  ;;  %v396_v61 = vmul.f32 %v384_v58, %v967_v5  ;;  %v304_v38 = vpop.f32.mrf.mxu0  ;;  %v397_v60 = vmul.f32 %v384_v58, %v972_v6 }
  0xc0   :  { %v305_v1 = vadd.f32 %v780_v56, %v304_v38  ;;  %v398_v5 = vmul.f32 %v384_v58, %v977_v7  ;;  %v399_v23 = vmul.f32 %v384_v58, %v986_v10  ;;  %v400_v7 = vmul.f32 %v384_v58, %v991_v11 }
  0xc1   :  { %v458_v13 = vsel %vm81_vm0, %v394_v28, 0.0  ;;  %v465_v14 = vsel %vm81_vm0, %v395_v59, 0.0  ;;  %v472_v46 = vsel %vm81_vm0, %v396_v61, 0.0  ;;  %v479_v6 = vsel %vm81_vm0, %v397_v60, 0.0 }
  0xc2   :  { %v789_v47 = vpop.eup %788  ;;  %v459_v2 = vrot.slane %v458_v13, 4  ;;  %v466_v8 = vrot.slane %v465_v14, 4  ;;  %v765_v48 = vmul.f32 -1.442695, %v305_v1  ;;  %v473_v22 = vrot.slane %v472_v46, 4 }
  0xc3   :  { %v1181_v3 = vadd.f32 1.0, %v789_v47  ;;  %v791_v4 = vpop.eup %790  ;;  %v480_v55 = vrot.slane %v479_v6, 4  ;;  %v486_v19 = vsel %vm81_vm0, %v398_v5, 0.0  ;;  %v493_v35 = vsel %vm81_vm0, %v399_v23, 0.0 }
  0xc4   :  { %v460_v33 = vadd.f32 %v459_v2, %v458_v13  ;;  %v467_v9 = vadd.f32 %v466_v8, %v465_v14  ;;  %v1187_v34 = vadd.f32 1.0, %v791_v4  ;;  %v474_v26 = vadd.f32 %v473_v22, %v472_v46 }
  0xc5   :  { %792 = vrcp.f32 %v1181_v3  ;;  %v481_v17 = vadd.f32 %v480_v55, %v479_v6  ;;  %v487_v10 = vrot.slane %v486_v19, 4  ;;  %v494_v42 = vrot.slane %v493_v35, 4 }
  0xc6   :  { %794 = vpow2.f32 %v765_v48  ;;  %v461_v45 = vrot.slane %v460_v33, 2  ;;  %v468_v54 = vrot.slane %v467_v9, 2  ;;  %v475_v62 = vrot.slane %v474_v26, 2 }
  0xc7   :  { %v482_v18 = vrot.slane %v481_v17, 2  ;;  %v488_v43 = vadd.f32 %v487_v10, %v486_v19  ;;  %796 = vrcp.f32 %v1187_v34  ;;  %v401_v53 = vmul.f32 %v384_v58, %v996_v12 }
  0xc8   :  { %v462_v37 = vadd.f32 %v461_v45, %v460_v33  ;;  %v469_v56 = vadd.f32 %v468_v54, %v467_v9  ;;  %v476_v36 = vadd.f32 %v475_v62, %v474_v26  ;;  %v500_v27 = vsel %vm81_vm0, %v400_v7, 0.0 }
  0xc9   :  { %v483_v40 = vadd.f32 %v482_v18, %v481_v17  ;;  %v489_v44 = vrot.slane %v488_v43, 2  ;;  %v495_v52 = vadd.f32 %v494_v42, %v493_v35  ;;  %v501_v13 = vrot.slane %v500_v27, 4 }
  0xca   :  { %v463_v63 = vrot.slane %v462_v37, 1  ;;  %v470_v0 = vrot.slane %v469_v56, 1  ;;  %v477_v25 = vrot.slane %v476_v36, 1  ;;  %v507_v47 = vsel %vm81_vm0, %v401_v53, 0.0 }
  0xcb   :  { %v1192_v24 = vpop.eup %792  ;;  %v484_v38 = vrot.slane %v483_v40, 1  ;;  %v490_v60 = vadd.f32 %v489_v44, %v488_v43  ;;  %v496_v1 = vrot.slane %v495_v52, 2  ;;  %v502_v8 = vadd.f32 %v501_v13, %v500_v27 }
  0xcc   :  { %v795_v11 = vpop.eup %794  ;;  %v342_v39 = vmul.f32 %v1192_v24, %v1181_v3  ;;  %v464_v28 = vadd.f32 %v463_v63, %v462_v37  ;;  %v471_v59 = vadd.f32 %v470_v0, %v469_v56  ;;  %v478_v61 = vadd.f32 %v477_v25, %v476_v36 }
  0xcd   :  { %v1195_v21 = vadd.f32 1.0, %v795_v11  ;;  %v1202_v14 = vpop.eup %796  ;;  %v485_v58 = vadd.f32 %v484_v38, %v483_v40  ;;  %v491_v46 = vrot.slane %v490_v60, 1  ;;  %v497_v2 = vadd.f32 %v496_v1, %v495_v52 }
  0xce   :  { %v343_v12 = vsub.f32 1.0, %v342_v39  ;;  %v508_v48 = vrot.slane %v507_v47, 4  ;;  %v537_v22 = vsel %vm242_vm1, %v471_v59, %v464_v28  ;;  %v327_v9 = vmul.f32 %v1202_v14, %v1187_v34 }
  0xcf   :  { %798 = vrcp.f32 %v1195_v21  ;;  %v492_v4 = vadd.f32 %v491_v46, %v490_v60  ;;  %v538_v5 = vsel %vm244_vm2, %v478_v61, %v537_v22  ;;  %v498_v6 = vrot.slane %v497_v2, 1 }
  0xd0   :  { %v503_v15 = vrot.slane %v502_v8, 2  ;;  %v509_v29 = vadd.f32 %v508_v48, %v507_v47  ;;  %v539_v45 = vsel %vm246_vm3, %v485_v58, %v538_v5  ;;  %v344_v54 = vmul.f32 %v1192_v24, %v343_v12 }
  0xd1   :  { %v540_v55 = vsel %vm248_vm4, %v492_v4, %v539_v45  ;;  %v352_v7 = vand.u32 2147483648, %v1181_v3  ;;  %v499_v56 = vadd.f32 %v498_v6, %v497_v2  ;;  %v328_v19 = vsub.f32 1.0, %v327_v9 }
  0xd2   :  { %v504_v16 = vadd.f32 %v503_v15, %v502_v8  ;;  %v510_v26 = vrot.slane %v509_v29, 2  ;;  %v367_v20 = vand.u32 2147483648, %v1195_v21  ;;  %v365_v35 = vand.u32 2147483647, %v1195_v21 }
  0xd3   :  { %v541_v63 = vsel %vm250_vm5, %v499_v56, %v540_v55  ;;  %v1218_v42 = vadd.f32 %v1192_v24, %v344_v54  ;;  %vm347_vm13 = vweird.f32 %v1192_v24  ;;  %vm361_vm14 = vweird.f32 %v1195_v21 }
  0xd4   :  { %v505_v62 = vrot.slane %v504_v16, 1  ;;  %v511_v17 = vadd.f32 %v510_v26, %v509_v29  ;;  %vm346_vm15 = vweird.f32 %v1181_v3  ;;  %v368_v43 = vor.u32 1.1754944e-38, %v367_v20 }
  0xd5   :  { %v799_v33 = vpop.eup %798  ;;  %vm1224_vm9 = vmor %vm346_vm15, %vm347_vm13  ;;  %v350_v27 = vand.u32 2147483647, %v1181_v3  ;;  %v1229_v39 = vor.u32 1.1754944e-38, %v352_v7  ;;  %vm366_vm10 = vcmp.eq.f32.partialorder %v365_v35, 8.507059e+37  ;;  %v1232_v44 = vmul.f32 %v1202_v14, %v328_v19 }
  0xd6   :  { %v357_v23 = vmul.f32 %v799_v33, %v1195_v21  ;;  %vm362_vm12 = vweird.f32 %v799_v33  ;;  %v506_v0 = vadd.f32 %v505_v62, %v504_v16  ;;  %v512_v36 = vrot.slane %v511_v17, 1 }
  0xd7   :  { %vm363_vm8 = vmor %vm361_vm14, %vm362_vm12  ;;  %v349_v52 = vsel %vm1224_vm9, %v1192_v24, %v1218_v42  ;;  %vm351_vm11 = vcmp.eq.f32.partialorder %v350_v27, 8.507059e+37  ;;  %vm332_vm12 = vweird.f32 %v1202_v14  ;;  %vm331_vm13 = vweird.f32 %v1187_v34 }
  0xd8   :  { %v358_v37 = vsub.f32 1.0, %v357_v23  ;;  %v513_v11 = vadd.f32 %v512_v36, %v511_v17  ;;  %v542_v53 = vsel %vm252_vm6, %v506_v0, %v541_v63  ;;  %v337_v27 = vand.u32 2147483648, %v1187_v34  ;;  %vm333_vm14 = vmor %vm331_vm13, %vm332_vm12 }
  0xda   :  { %v359_v10 = vmul.f32 %v799_v33, %v358_v37  ;;  %v1239_v28 = vsel %vm254_vm7, %v513_v11, %v542_v53 }
  0xdc   :  { %v360_v18 = vadd.f32 %v799_v33, %v359_v10 }
  0xde   :  { %v364_v40 = vsel %vm363_vm8, %v799_v33, %v360_v18 }
  0xdf   :  { %v369_v21 = vsel %vm366_vm10, %v368_v43, %v364_v40  ;;  %v354_v40 = vsel %vm351_vm11, %v1229_v39, %v349_v52 }
  0xe0   :  { %v386_v59 = vmul.f32 %v369_v21, %v1022_v30  ;;  %v387_v3 = vmul.f32 %v369_v21, %v1027_v31  ;;  %v388_v61 = vmul.f32 %v369_v21, %v1032_v32  ;;  %v389_v38 = vmul.f32 %v369_v21, %v1046_v41 }
  0xe1   :  { %v390_v60 = vmul.f32 %v369_v21, %v1062_v49  ;;  %v391_v1 = vmul.f32 %v369_v21, %v1067_v50  ;;  %v392_v13 = vmul.f32 %v369_v21, %v1072_v51  ;;  %v393_v12 = vmul.f32 %v369_v21, %v1115_v57 }
  0xe2   :  { %v402_v24 = vsel %vm81_vm0, %v386_v59, 0.0  ;;  %v409_v58 = vsel %vm81_vm0, %v387_v3, 0.0  ;;  %v416_v30 = vsel %vm81_vm0, %v388_v61, 0.0  ;;  %v423_v31 = vsel %vm81_vm0, %v389_v38, 0.0 }
  0xe3   :  { %v403_v46 = vrot.slane %v402_v24, 4  ;;  %v410_v32 = vrot.slane %v409_v58, 4  ;;  %v417_v47 = vrot.slane %v416_v30, 4  ;;  %v424_v41 = vrot.slane %v423_v31, 4 }
  0xe4   :  { %v430_v49 = vsel %vm81_vm0, %v390_v60, 0.0  ;;  %v437_v50 = vsel %vm81_vm0, %v391_v1, 0.0  ;;  %v444_v51 = vsel %vm81_vm0, %v392_v13, 0.0  ;;  %v451_v57 = vsel %vm81_vm0, %v393_v12, 0.0 }
  0xe5   :  { %v404_v2 = vadd.f32 %v403_v46, %v402_v24  ;;  %v411_v8 = vadd.f32 %v410_v32, %v409_v58  ;;  %v418_v48 = vadd.f32 %v417_v47, %v416_v30  ;;  %v425_v22 = vadd.f32 %v424_v41, %v423_v31 }
  0xe6   :  { %v431_v4 = vrot.slane %v430_v49, 4  ;;  %v438_v5 = vrot.slane %v437_v50, 4  ;;  %v445_v33 = vrot.slane %v444_v51, 4  ;;  %v452_v9 = vrot.slane %v451_v57, 4 }
  0xe7   :  { %v405_v6 = vrot.slane %v404_v2, 2  ;;  %v412_v15 = vrot.slane %v411_v8, 2  ;;  %v419_v29 = vrot.slane %v418_v48, 2  ;;  %v426_v23 = vrot.slane %v425_v22, 2 }
  0xe8   :  { %v432_v45 = vadd.f32 %v431_v4, %v430_v49  ;;  %v439_v54 = vadd.f32 %v438_v5, %v437_v50  ;;  %v446_v16 = vadd.f32 %v445_v33, %v444_v51  ;;  %v453_v26 = vadd.f32 %v452_v9, %v451_v57 }
  0xe9   :  { %v406_v55 = vadd.f32 %v405_v6, %v404_v2  ;;  %v413_v7 = vadd.f32 %v412_v15, %v411_v8  ;;  %v420_v37 = vadd.f32 %v419_v29, %v418_v48  ;;  %v427_v56 = vadd.f32 %v426_v23, %v425_v22 }
  0xea   :  { %v433_v19 = vrot.slane %v432_v45, 2  ;;  %v440_v20 = vrot.slane %v439_v54, 2  ;;  %v447_v62 = vrot.slane %v446_v16, 2  ;;  %v454_v17 = vrot.slane %v453_v26, 2 }
  0xeb   :  { %v407_v10 = vrot.slane %v406_v55, 1  ;;  %v414_v35 = vrot.slane %v413_v7, 1  ;;  %v421_v63 = vrot.slane %v420_v37, 1  ;;  %v428_v42 = vrot.slane %v427_v56, 1 }
  0xec   :  { %v434_v0 = vadd.f32 %v433_v19, %v432_v45  ;;  %v441_v36 = vadd.f32 %v440_v20, %v439_v54  ;;  %v448_v18 = vadd.f32 %v447_v62, %v446_v16  ;;  %v455_v43 = vadd.f32 %v454_v17, %v453_v26  ;;  %v781_v54 = vld [vmem:[%s1357_s4] ss:$0 sm:$0xff]  ;;  %v656_v16 = vld [vmem:[%s1358_s5 + $0x78] sm:$0xff]  ;;  %v655_v26 = vld [vmem:[%s1358_s5 + $0x70] sm:$0xff]  ;;  %s746_s4 = sshll.u32 %s888_s21, 4  ;;  %s747_s4 = int_to_ptr.vmem [resolvable:$true] %s746_s4 }
  0xed   :  { %v408_v11 = vadd.f32 %v407_v10, %v406_v55  ;;  %v415_v53 = vadd.f32 %v414_v35, %v413_v7  ;;  %v422_v25 = vadd.f32 %v421_v63, %v420_v37  ;;  %v330_v3 = vadd.f32 %v1202_v14, %v1232_v44  ;;  %661 = vmatpush.msra.mxu2 %v656_v16  ;;  %v654_v55 = vld [vmem:[%s1358_s5 + $0x68] sm:$0xff]  ;;  %v652_v20 = vld [vmem:[%s1358_s5 + $0x58] sm:$0xff]  ;;  %v651_v17 = vld [vmem:[%s1358_s5 + $0x50] sm:$0xff] }
  0xee   :  { %v435_v21 = vrot.slane %v434_v0, 1  ;;  %v442_v59 = vrot.slane %v441_v36, 1  ;;  %v449_v61 = vrot.slane %v448_v18, 1  ;;  %v547_v60 = vmul.f32 %v1239_v28, %v354_v40  ;;  %v650_v35 = vld [vmem:[%s1358_s5 + $0x48] sm:$0xff] }
  0xef   :  { %v530_v38 = vsel %vm242_vm1, %v415_v53, %v408_v11  ;;  %v429_v1 = vadd.f32 %v428_v42, %v427_v56  ;;  %v456_v13 = vrot.slane %v455_v43, 1  ;;  %v335_v12 = vand.u32 2147483647, %v1187_v34  ;;  %662 = vmatpush.msra.mxu2 %v655_v26  ;;  %v653_v56 = vld [vmem:[%s1358_s5 + $0x60] sm:$0xff]  ;;  %v647_v53 = vld [vmem:[%s1358_s5 + $0x30] sm:$0xff]  ;;  %v646_v40 = vld [vmem:[%s1358_s5 + $0x28] sm:$0xff] }
  0xf0   :  { %v436_v24 = vadd.f32 %v435_v21, %v434_v0  ;;  %v531_v39 = vsel %vm244_vm2, %v422_v25, %v530_v38  ;;  %v555_v52 = vsel %vm81_vm0, %v547_v60, 0.0  ;;  %v443_v44 = vadd.f32 %v442_v59, %v441_v36  ;;  %v649_v42 = vld [vmem:[%s1358_s5 + $0x40] sm:$0xff]  ;;  %v644_v38 = vld [vmem:[%s1358_s5 + $0x18] sm:$0xff] }
  0xf1   :  { %v532_v58 = vsel %vm246_vm3, %v429_v1, %v531_v39  ;;  %v556_v28 = vrot.slane %v555_v52, 4  ;;  %v334_v30 = vsel %vm333_vm14, %v1202_v14, %v330_v3  ;;  %v450_v31 = vadd.f32 %v449_v61, %v448_v18  ;;  %663 = vmatpush.msra.mxu2 %v654_v55  ;;  %v648_v18 = vld [vmem:[%s1358_s5 + $0x38] sm:$0xff]  ;;  %v645_v3 = vld [vmem:[%s1358_s5 + $0x20] sm:$0xff]  ;;  %v643_v1 = vld [vmem:[%s1358_s5 + $0x10] sm:$0xff] }
  0xf2   :  { %v533_v46 = vsel %vm248_vm4, %v436_v24, %v532_v58  ;;  %v338_v32 = vor.u32 1.1754944e-38, %v337_v27  ;;  %v457_v47 = vadd.f32 %v456_v13, %v455_v43  ;;  %vm336_vm2 = vcmp.eq.f32.partialorder %v335_v12, 8.507059e+37  ;;  %v642_v12 = vld [vmem:[%s1358_s5 + $0x8] sm:$0xff] }
  0xf3   :  { %v534_v34 = vsel %vm250_vm5, %v443_v44, %v533_v46  ;;  %v557_v41 = vadd.f32 %v556_v28, %v555_v52  ;;  %664 = vmatpush.msra.mxu2 %v653_v56  ;;  %v641_v52 = vld [vmem:[%s1358_s5] sm:$0xff] }
  0xf4   :  { %v535_v49 = vsel %vm252_vm6, %v450_v31, %v534_v34  ;;  %v339_v50 = vsel %vm336_vm2, %v338_v32, %v334_v30 }
  0xf5   :  { %v536_v51 = vsel %vm254_vm7, %v457_v47, %v535_v49  ;;  %v558_v57 = vrot.slane %v557_v41, 2  ;;  %665 = vmatpush.msra.mxu2 %v652_v20 }
  0xf6   :  { %v546_v2 = vmul.f32 %v536_v51, %v339_v50 }
  0xf7   :  { %v559_v14 = vadd.f32 %v558_v57, %v557_v41  ;;  %666 = vmatpush.msra.mxu2 %v651_v17 }
  0xf8   :  { %v548_v8 = vsel %vm81_vm0, %v546_v2, 0.0 }
  0xf9   :  { %v549_v48 = vrot.slane %v548_v8, 4  ;;  %v560_v5 = vrot.slane %v559_v14, 1  ;;  %667 = vmatpush.msra.mxu2 %v650_v35 }
  0xfb   :  { %v550_v22 = vadd.f32 %v549_v48, %v548_v8  ;;  %v561_v6 = vadd.f32 %v560_v5, %v559_v14  ;;  %668 = vmatpush.msra.mxu2 %v649_v42 }
  0xfd   :  { %v551_v4 = vrot.slane %v550_v22, 2  ;;  %v1279_v23 = vmul.f32 0.015625, %v561_v6  ;;  %669 = vmatpush.msra.mxu2 %v648_v18  ;;  %v708_v6 = vld [vmem:[#allocation5 + $0x10] sm:$0xff] }
  0xff   :  { %v552_v33 = vadd.f32 %v551_v4, %v550_v22  ;;  %670 = vmatpush.msra.mxu2 %v647_v53 }
 0x101   :  { %v553_v9 = vrot.slane %v552_v33, 1  ;;  %671 = vmatpush.msra.mxu2 %v646_v40 }
 0x103   :  { %v554_v15 = vadd.f32 %v553_v9, %v552_v33  ;;  %672 = vmatpush.msra.mxu2 %v645_v3  ;;  %v709_v9 = vld [vmem:[#allocation5 + $0x18] sm:$0xff] }
 0x104   :  { %732 = vmatpush.msra.mxu3 %v709_v9 }
 0x105   :  { %v1277_v29 = vmul.f32 0.015625, %v554_v15  ;;  %673 = vmatpush.msra.mxu2 %v644_v38  ;;  %v707_v15 = vld [vmem:[#allocation5 + $0x8] sm:$0xff] }
 0x106   :  { %733 = vmatpush.msra.mxu3 %v708_v6 }
 0x107   :  { %v574_v45 = vsel %vm242_vm1, %v1279_v23, %v1277_v29  ;;  %674 = vmatpush.msra.mxu2 %v643_v1 }
 0x108   :  { %767 = vmatmul.msk.f32.vlgmr.msrb.gmra.mxu1 %vm81_vm0, %v574_v45  ;;  %v706_v45 = vld [vmem:[#allocation5] sm:$0xff]  ;;  %734 = vmatpush.msra.mxu3 %v707_v15 }
 0x109   :  { %675 = vmatpush.msra.mxu2 %v642_v12 }
 0x10a   :  { %735 = vmatpush.msra.mxu3 %v706_v45 }
 0x10b   :  { %676 = vmatpush.msra.mxu2 %v641_v52 }
 0x185   :  { %v594_v7 = vpop.f32.mrf.mxu1 }
 0x186   :  { %v1297_v37 = vadd.f32 %v781_v54, %v594_v7  ;;  %v782_v54 = vld [vmem:[%s1359_s6] ss:$0 sm:$0xff] }
 0x188   :  { %v598_v19 = vmul.f32 0.70710677, %v1297_v37  ;;  %v597_v4 = vmul.f32 0.5, %v1297_v37 }
 0x18a   :  { %v599_v62 = vmul.f32 %v598_v19, %v598_v19 }
 0x18c   :  { %v600_v10 = vmin.f32 %v599_v62, 16.0 }
 0x18e   :  { %v601_v63 = vmul.f32 2.1237322e-06, %v600_v10  ;;  %v612_v0 = vmul.f32 3.8918573e-05, %v600_v10 }
 0x190   :  { %v602_v36 = vadd.f32 0.00028619796, %v601_v63  ;;  %v613_v43 = vadd.f32 0.001143296, %v612_v0 }
 0x192   :  { %v603_v11 = vmul.f32 %v602_v36, %v600_v10  ;;  %v614_v25 = vmul.f32 %v613_v43, %v600_v10 }
 0x194   :  { %v615_v21 = vadd.f32 0.014752088, %v614_v25  ;;  %v604_v59 = vadd.f32 0.0036580483, %v603_v11  ;;  %v783_v25 = vld [vmem:[%s1361_s8] ss:$0 sm:$0xff] }
 0x196   :  { %v616_v61 = vmul.f32 %v615_v21, %v600_v10  ;;  %v605_v27 = vmul.f32 %v604_v59, %v600_v10 }
 0x198   :  { %v617_v60 = vadd.f32 0.112945676, %v616_v61  ;;  %v606_v39 = vadd.f32 0.05243302, %v605_v27 }
 0x19a   :  { %v618_v13 = vmul.f32 %v617_v60, %v600_v10  ;;  %v607_v28 = vmul.f32 %v606_v39, %v600_v10 }
 0x19c   :  { %v619_v24 = vadd.f32 0.4994258, %v618_v13  ;;  %v608_v30 = vadd.f32 0.18741608, %v607_v28 }
 0x19e   :  { %v620_v44 = vmul.f32 %v619_v24, %v600_v10  ;;  %v609_v46 = vmul.f32 %v608_v30, %v600_v10 }
 0x1a0   :  { %v621_v58 = vadd.f32 1.0, %v620_v44  ;;  %v610_v41 = vadd.f32 1.1283791, %v609_v46 }
 0x1a2   :  { %800 = vrcp.f32 %v621_v58  ;;  %v633_v34 = vand.u32 2147483648, %v621_v58  ;;  %v631_v50 = vand.u32 2147483647, %v621_v58  ;;  %vm627_vm4 = vweird.f32 %v621_v58 }
 0x1a3   :  { %v611_v2 = vmul.f32 %v610_v41, %v598_v19 }
 0x1a4   :  { %v634_v57 = vor.u32 1.1754944e-38, %v633_v34  ;;  %vm632_vm6 = vcmp.eq.f32.partialorder %v631_v50, 8.507059e+37 }
 0x1a8   :  { %v801_v31 = vpop.eup %800 }
 0x1a9   :  { %v623_v32 = vmul.f32 %v801_v31, %v621_v58  ;;  %vm628_vm3 = vweird.f32 %v801_v31 }
 0x1aa   :  { %vm629_vm5 = vmor %vm627_vm4, %vm628_vm3 }
 0x1ab   :  { %v624_v47 = vsub.f32 1.0, %v623_v32 }
 0x1ad   :  { %v625_v49 = vmul.f32 %v801_v31, %v624_v47 }
 0x1af   :  { %v626_v51 = vadd.f32 %v801_v31, %v625_v49 }
 0x1b1   :  { %v630_v8 = vsel %vm629_vm5, %v801_v31, %v626_v51 }
 0x1b2   :  { %v635_v48 = vsel %vm632_vm6, %v634_v57, %v630_v8 }
 0x1b3   :  { %v636_v14 = vmul.f32 %v635_v48, %v611_v2 }
 0x1b5   :  { %v768_v22 = vclamps-f32 %v636_v14, 1.0 }
 0x1b7   :  { %v639_v5 = vadd.f32 1.0, %v768_v22 }
 0x1b9   :  { %v640_v33 = vmul.f32 %v639_v5, %v597_v4 }
 0x1bb   :  { %677 = vmatmul.f32.vlgmr.msra.gmra.mxu2 %v640_v33 }
 0x23e   :  { %v678_v16 = vpop.f32.mrf.mxu2 }
 0x23f   :  { %v679_v26 = vadd.f32 %v782_v54, %v678_v16 }
 0x241   :  { %v769_v55 = vmul.f32 -1.442695, %v679_v26 }
 0x243   :  { %802 = vpow2.f32 %v769_v55 }
 0x249   :  { %v803_v7 = vpop.eup %802 }
 0x24a   :  { %v684_v37 = vadd.f32 1.0, %v803_v7 }
 0x24c   :  { %804 = vrcp.f32 %v684_v37  ;;  %v696_v62 = vand.u32 2147483648, %v684_v37  ;;  %v694_v10 = vand.u32 2147483647, %v684_v37  ;;  %vm690_vm15 = vweird.f32 %v684_v37 }
 0x24e   :  { %v697_v63 = vor.u32 1.1754944e-38, %v696_v62  ;;  %vm695_vm9 = vcmp.eq.f32.partialorder %v694_v10, 8.507059e+37 }
 0x252   :  { %v805_v56 = vpop.eup %804 }
 0x253   :  { %v686_v19 = vmul.f32 %v805_v56, %v684_v37  ;;  %vm691_vm7 = vweird.f32 %v805_v56 }
 0x254   :  { %vm692_vm8 = vmor %vm690_vm15, %vm691_vm7 }
 0x255   :  { %v687_v20 = vsub.f32 1.0, %v686_v19 }
 0x257   :  { %v688_v17 = vmul.f32 %v805_v56, %v687_v20 }
 0x259   :  { %v689_v35 = vadd.f32 %v805_v56, %v688_v17 }
 0x25b   :  { %v693_v42 = vsel %vm692_vm8, %v805_v56, %v689_v35 }
 0x25c   :  { %v698_v0 = vsel %vm695_vm9, %v697_v63, %v693_v42 }
 0x25d   :  { %v701_v36 = vrot.slane %v698_v0, 1  ;;  %v704_v43 = vmul.f32 %v698_v0, %v1277_v29 }
 0x25f   :  { %v705_v18 = vmul.f32 %v701_v36, %v1279_v23 }
 0x261   :  { %v716_v11 = vrot.slane %v705_v18, 7 }
 0x263   :  { %v717_v53 = vsel %vm242_vm1, %v716_v11, %v704_v43 }
 0x264   :  { %770 = vmatmul.msk.f32.vlgmr.msra.gmra.mxu3 %vm81_vm0, %v717_v53 }
 0x2e7   :  { %v737_v40 = vpop.f32.mrf.mxu3 }
 0x2e8   :  { %v738_v21 = vadd.f32 %v783_v25, %v737_v40 }
 0x2ea   :  { %740 = vst [vmem:[#allocation7] sm:$0x3] %v738_v21 }
 0x2eb   :  { %751 = dma.vmem_to_hbm [thread:$0]  %s747_s4, 32, %s749_s7, [#allocation4]  }
 0x2ec   :  { %882 = dma.done.wait [#allocation4], 32  }
 0x2ed   :  { %883 = vsyncadd [#allocation4], 4294967264 }
 0x2ee   :  { %756 = vsyncpa [#allocation3], 1 }
 0x2ef   :  { %757 = vsyncpa [#allocation6], 1 }
 0x2f0   :  { %758 = vsyncpa [#allocation4], 1 }

</bundles_post_ra>
